<compile_context>
chip_gen: v7x
topology: tpu7x:2x2x1
jax: 0.10.0
libtpu: 0.0.40
codegen_flags: <defaults>
</compile_context>

<pallas_src>
import jax
import jax.numpy as jnp
from jax import lax
from jax.experimental import pallas as pl
from jax.experimental.pallas import tpu as pltpu


# ----------------------------- Pallas kernels ------------------------------


def _multiscale_kernel(patches_ref, wms_ref, bms_ref, q_ref, o_ref):
    # patches_ref: (S, K)       im2col taps of one batch, taps/channels on lanes
    # wms_ref:     (K, hidden)  block-diagonal packed weights of the 4 dilated convs
    # bms_ref:     (1, hidden)  concatenated conv biases
    # q_ref:       (S2, S)      constant 2x2 average-pool matrix
    # o_ref:       (S2, hidden)
    p = patches_ref[...].astype(jnp.float32)
    y = jnp.dot(p, wms_ref[...], preferred_element_type=jnp.float32) + bms_ref[...]
    o_ref[...] = jnp.dot(q_ref[...], y, preferred_element_type=jnp.float32)


def _head_kernel(x_ref, w1_ref, b1_ref, w2_ref, bns_ref, bnb_ref, w3_ref, b3_ref,
                 o_ref):
    # x_ref: (rows, hidden) multiscale features, channels last (lanes).
    x = x_ref[...].astype(jnp.float32)
    # conv1x1_1 + ReLU
    t = jnp.dot(x, w1_ref[...], preferred_element_type=jnp.float32) + b1_ref[...]
    t = jnp.maximum(t, 0.0)
    # conv1x1_2 (no bias) + folded BatchNorm2d (inference / running-stats semantics)
    v = jnp.dot(t, w2_ref[...], preferred_element_type=jnp.float32)
    v = v * bns_ref[...] + bnb_ref[...]
    # attention branch: ReLU -> conv1x1_3 -> softplus (numerically stable form)
    a = jnp.dot(jnp.maximum(v, 0.0), w3_ref[...],
                preferred_element_type=jnp.float32) + b3_ref[...]
    a = jnp.maximum(a, 0.0) + jnp.log(1.0 + jnp.exp(-jnp.abs(a)))
    # F.normalize(v, p=2, dim=channel)
    norm = jnp.sqrt(jnp.sum(v * v, axis=-1, keepdims=True))
    n = v / jnp.maximum(norm, 1e-12)
    o_ref[...] = n * a


# ------------------------------ wrapper -------------------------------------


def _pick_row_tile(n, cap=1024):
    """Largest multiple-of-8 divisor of n that is <= cap and leaves >= 2 grid
    steps (so v7x can shard the row axis across both TensorCores)."""
    best = None
    t = 8
    while t <= min(cap, n):
        if n % t == 0 and n // t >= 2:
            best = t
        t += 8
    return best if best is not None else n


def local_branch_forward(x, params, *, rates=(3, 5, 7, 9), factor=2, bn_eps=1e-5):
    B, Cin, H, W = x.shape
    ms_w, ms_b = params["ms_w"], params["ms_b"]
    cb = ms_w[0].shape[0]                 # channels per dilated branch
    hidden = cb * len(rates)
    Cout = params["w1"].shape[0]
    if factor == 2:
        H2, W2 = H // 2, W // 2
    else:
        H2, W2 = H, W
    S, S2 = H * W, H2 * W2
    K = len(rates) * 9 * Cin

    # ---- layout-only wrapper work (no arithmetic on activations, native dtype) ----
    x_nhwc = jnp.transpose(x, (0, 2, 3, 1))
    pad = max(rates)
    xp = jnp.pad(x_nhwc, ((0, 0), (pad, pad), (pad, pad), (0, 0)))
    taps = []
    for r in rates:
        for kh in range(3):
            for kw in range(3):
                h0 = pad + (kh - 1) * r
                w0 = pad + (kw - 1) * r
                taps.append(xp[:, h0:h0 + H, w0:w0 + W, :])
    patches = jnp.concatenate(taps, axis=-1).reshape(B, S, K)

    # ---- parameter packing (tiny, once per call) ----
    wms = jnp.zeros((K, hidden), jnp.float32)
    for ri, w in enumerate(ms_w):
        wt = jnp.transpose(w.astype(jnp.float32), (2, 3, 1, 0)).reshape(9 * Cin, cb)
        wms = wms.at[ri * 9 * Cin:(ri + 1) * 9 * Cin, ri * cb:(ri + 1) * cb].set(wt)
    bms = jnp.concatenate(ms_b).astype(jnp.float32).reshape(1, hidden)

    if factor == 2:
        rr, cc = [], []
        for i2 in range(H2):
            for j2 in range(W2):
                for dh in range(2):
                    for dw in range(2):
                        rr.append(i2 * W2 + j2)
                        cc.append((2 * i2 + dh) * W + (2 * j2 + dw))
        q = jnp.zeros((S2, S), jnp.float32).at[jnp.array(rr), jnp.array(cc)].add(0.25)
    else:
        q = jnp.eye(S, dtype=jnp.float32)

    # ---- kernel 1: dilated convs + bias + concat + avg-pool, one batch per step ----
    ms_feat = pl.pallas_call(
        _multiscale_kernel,
        out_shape=jax.ShapeDtypeStruct((B * S2, hidden), jnp.float32),
        grid=(B,),
        in_specs=[
            pl.BlockSpec((None, S, K), lambda b: (b, 0, 0)),
            pl.BlockSpec((K, hidden), lambda b: (0, 0)),
            pl.BlockSpec((1, hidden), lambda b: (0, 0)),
            pl.BlockSpec((S2, S), lambda b: (0, 0)),
        ],
        out_specs=pl.BlockSpec((S2, hidden), lambda b: (b, 0)),
        compiler_params=pltpu.CompilerParams(dimension_semantics=("parallel",)),
    )(patches, wms, bms, q)

    # ---- head parameters (BN folded with running stats) ----
    # TODO(synk): training-mode BatchNorm (batch statistics) is not computed in-kernel;
    # inference semantics (running_mean/var) are used.
    w1t = params["w1"].astype(jnp.float32).T
    b1 = params["b1"].astype(jnp.float32).reshape(1, Cout)
    w2t = params["w2"].astype(jnp.float32).T
    w3t = params["w3"].astype(jnp.float32).T
    b3 = params["b3"].astype(jnp.float32).reshape(1, Cout)
    bn_scale = (params["bn_gamma"] / jnp.sqrt(params["bn_var"] + bn_eps)).astype(jnp.float32)
    bn_shift = (params["bn_beta"] - params["bn_mean"] * bn_scale).astype(jnp.float32)
    bns = bn_scale.reshape(1, Cout)
    bnb = bn_shift.reshape(1, Cout)

    N = B * S2
    row_tile = _pick_row_tile(N)

    out = pl.pallas_call(
        _head_kernel,
        out_shape=jax.ShapeDtypeStruct((N, Cout), jnp.float32),
        grid=(N // row_tile,),
        in_specs=[
            pl.BlockSpec((row_tile, hidden), lambda i: (i, 0)),
            pl.BlockSpec((hidden, Cout), lambda i: (0, 0)),
            pl.BlockSpec((1, Cout), lambda i: (0, 0)),
            pl.BlockSpec((Cout, Cout), lambda i: (0, 0)),
            pl.BlockSpec((1, Cout), lambda i: (0, 0)),
            pl.BlockSpec((1, Cout), lambda i: (0, 0)),
            pl.BlockSpec((Cout, Cout), lambda i: (0, 0)),
            pl.BlockSpec((1, Cout), lambda i: (0, 0)),
        ],
        out_specs=pl.BlockSpec((row_tile, Cout), lambda i: (i, 0)),
        compiler_params=pltpu.CompilerParams(dimension_semantics=("parallel",)),
    )(ms_feat, w1t, b1, w2t, bns, bnb, w3t, b3)

    out = out.reshape(B, H2, W2, Cout)
    return jnp.transpose(out, (0, 3, 1, 2))          # back to NCHW


# --------------------------- params & reference ------------------------------


def init_params(key, in_channel, hidden_channel, out_channel, rates):
    cb = hidden_channel // 4
    ks = jax.random.split(key, 8)

    def kaiming(k, shape, fan_in):
        return jax.random.normal(k, shape, jnp.float32) * (2.0 / fan_in) ** 0.5

    kws = jax.random.split(ks[0], len(rates))
    kbs = jax.random.split(ks[1], len(rates))
    ms_w = [kaiming(kws[i], (cb, in_channel, 3, 3), in_channel * 9) for i in range(len(rates))]
    ms_b = [jax.random.normal(kbs[i], (cb,), jnp.float32) * 0.1 for i in range(len(rates))]
    return {
        "ms_w": ms_w,
        "ms_b": ms_b,
        "w1": kaiming(ks[2], (out_channel, hidden_channel), hidden_channel),
        "b1": jax.random.normal(ks[3], (out_channel,), jnp.float32) * 0.1,
        "w2": kaiming(ks[4], (out_channel, out_channel), out_channel),
        "w3": kaiming(ks[5], (out_channel, out_channel), out_channel),
        "b3": jax.random.normal(ks[6], (out_channel,), jnp.float32) * 0.1,
        "bn_gamma": 1.0 + 0.01 * jax.random.normal(ks[7], (out_channel,), jnp.float32),
        "bn_beta": jnp.zeros((out_channel,), jnp.float32),
        "bn_mean": jnp.zeros((out_channel,), jnp.float32),
        "bn_var": jnp.ones((out_channel,), jnp.float32),
    }


def local_branch_reference(x, params, rates=(3, 5, 7, 9), factor=2, bn_eps=1e-5):
    """Pure-JAX (XLA) reference mirroring the PyTorch LocalBranch forward."""
    feats = []
    for w, b, r in zip(params["ms_w"], params["ms_b"], rates):
        y = lax.conv_general_dilated(
            x.astype(jnp.float32), w, window_strides=(1, 1),
            padding=((r, r), (r, r)), rhs_dilation=(r, r),
            dimension_numbers=("NCHW", "OIHW", "NCHW"))
        y = y + b[None, :, None, None]
        if factor == 2:
            y = lax.reduce_window(y, 0.0, lax.add, (1, 1, 2, 2), (1, 1, 2, 2),
                                  "VALID") * 0.25
        feats.append(y)
    f = jnp.concatenate(feats, axis=1)
    v = jnp.einsum("bchw,oc->bohw", f, params["w1"]) + params["b1"][None, :, None, None]
    v = jnp.maximum(v, 0.0)
    v = jnp.einsum("bchw,oc->bohw", v, params["w2"])
    scale = params["bn_gamma"] / jnp.sqrt(params["bn_var"] + bn_eps)
    shift = params["bn_beta"] - params["bn_mean"] * scale
    v = v * scale[None, :, None, None] + shift[None, :, None, None]
    a = jnp.einsum("bchw,oc->bohw", jnp.maximum(v, 0.0), params["w3"]) \
        + params["b3"][None, :, None, None]
    a = jnp.maximum(a, 0.0) + jnp.log(1.0 + jnp.exp(-jnp.abs(a)))     # softplus
    norm = jnp.sqrt(jnp.sum(v * v, axis=1, keepdims=True))
    n = v / jnp.maximum(norm, 1e-12)
    return n * a


if __name__ == "__main__":
    key = jax.random.PRNGKey(0)
    kx, kp = jax.random.split(key)

    B, Cin, H, W = 2, 4, 16, 16
    hidden_channel, out_channel, factor = 8, 16, 2
    rates = (3, 5, 7, 9)

    x = jax.random.normal(kx, (B, Cin, H, W), dtype=jnp.float32)
    params = init_params(kp, Cin, hidden_channel, out_channel, rates)

    out = local_branch_forward(x, params, rates=rates, factor=factor)
    out = jax.block_until_ready(out)

    ref = local_branch_reference(x, params, rates=rates, factor=factor)
    assert out.shape == (B, out_channel, H // 2, W // 2), out.shape
    max_err = float(jnp.max(jnp.abs(out - ref)))
    assert jnp.allclose(out, ref, atol=1e-4, rtol=1e-4), max_err
    print("KERNEL_OK")
</pallas_src>

<mosaic_0001>
module attributes {stable_mosaic.version = 11 : i64} {
  func.func @_multiscale_kernel(%arg0: i32, %arg1: memref<1x256x144xf32, #tpu.memory_space<vmem>>, %arg2: memref<144x8xf32, #tpu.memory_space<vmem>>, %arg3: memref<1x8xf32, #tpu.memory_space<vmem>>, %arg4: memref<64x256xf32, #tpu.memory_space<vmem>>, %arg5: memref<64x8xf32, #tpu.memory_space<vmem>>) attributes {dimension_semantics = [#tpu.dimension_semantics<parallel>], iteration_bounds = array<i64: 2>, scalar_prefetch = 0 : i64, scratch_operands = 0 : i64, tpu.core_type = #tpu.core_type<tc>, window_params = [{transform_indices = @transform_0, window_bounds = array<i64: 1, 256, 144>}, {pipeline_mode = #tpu.pipeline_mode<synchronous>, transform_indices = @transform_1, window_bounds = array<i64: 144, 8>}, {pipeline_mode = #tpu.pipeline_mode<synchronous>, transform_indices = @transform_2, window_bounds = array<i64: 1, 8>}, {pipeline_mode = #tpu.pipeline_mode<synchronous>, transform_indices = @transform_3, window_bounds = array<i64: 64, 256>}, {transform_indices = @transform_4, window_bounds = array<i64: 64, 8>}]} {
    %c0 = arith.constant 0 : index
    %c0_0 = arith.constant 0 : index
    %c0_1 = arith.constant 0 : index
    %0 = vector.load %arg1[%c0, %c0_0, %c0_1] : memref<1x256x144xf32, #tpu.memory_space<vmem>>, vector<1x256x144xf32>
    %1 = vector.shape_cast %0 : vector<1x256x144xf32> to vector<256x144xf32>
    %c0_2 = arith.constant 0 : index
    %c0_3 = arith.constant 0 : index
    %2 = vector.load %arg2[%c0_2, %c0_3] : memref<144x8xf32, #tpu.memory_space<vmem>>, vector<144x8xf32>
    %cst = arith.constant dense<0.000000e+00> : vector<256x8xf32>
    %3 = tpu.matmul %1, %2, %cst {dimension_numbers = #tpu.dot_dimension_numbers<[1], [0], [0], [1], [0, 0, 1, 1], [], []>} : vector<256x144xf32>, vector<144x8xf32>, vector<256x8xf32> -> vector<256x8xf32>
    %c0_4 = arith.constant 0 : index
    %c0_5 = arith.constant 0 : index
    %4 = vector.load %arg3[%c0_4, %c0_5] : memref<1x8xf32, #tpu.memory_space<vmem>>, vector<1x8xf32>
    %5 = vector.broadcast %4 : vector<1x8xf32> to vector<256x8xf32>
    %6 = arith.addf %3, %5 : vector<256x8xf32>
    %c0_6 = arith.constant 0 : index
    %c0_7 = arith.constant 0 : index
    %7 = vector.load %arg4[%c0_6, %c0_7] : memref<64x256xf32, #tpu.memory_space<vmem>>, vector<64x256xf32>
    %cst_8 = arith.constant dense<0.000000e+00> : vector<64x8xf32>
    %8 = tpu.matmul %7, %6, %cst_8 {dimension_numbers = #tpu.dot_dimension_numbers<[1], [0], [0], [1], [0, 0, 1, 1], [], []>} : vector<64x256xf32>, vector<256x8xf32>, vector<64x8xf32> -> vector<64x8xf32>
    %c0_9 = arith.constant 0 : index
    %c0_10 = arith.constant 0 : index
    %9 = vector.load %arg5[%c0_9, %c0_10] : memref<64x8xf32, #tpu.memory_space<vmem>>, vector<64x8xf32>
    tpu.vector_store %arg5[%c0_9, %c0_10], %8 {strides = array<i32>} : memref<64x8xf32, #tpu.memory_space<vmem>>, vector<64x8xf32>,
    return
  }
  func.func @transform_0(%arg0: i32) -> (i32, i32, i32) {
    %c0_i32 = arith.constant 0 : i32
    %c0_i32_0 = arith.constant 0 : i32
    %c0_i32_1 = arith.constant 0 : i32
    return %arg0, %c0_i32, %c0_i32_0 : i32, i32, i32
  }
  func.func @transform_1(%arg0: i32) -> (i32, i32) {
    %c0_i32 = arith.constant 0 : i32
    %c0_i32_0 = arith.constant 0 : i32
    %c0_i32_1 = arith.constant 0 : i32
    return %c0_i32, %c0_i32_0 : i32, i32
  }
  func.func @transform_2(%arg0: i32) -> (i32, i32) {
    %c0_i32 = arith.constant 0 : i32
    %c0_i32_0 = arith.constant 0 : i32
    %c0_i32_1 = arith.constant 0 : i32
    return %c0_i32, %c0_i32_0 : i32, i32
  }
  func.func @transform_3(%arg0: i32) -> (i32, i32) {
    %c0_i32 = arith.constant 0 : i32
    %c0_i32_0 = arith.constant 0 : i32
    %c0_i32_1 = arith.constant 0 : i32
    return %c0_i32, %c0_i32_0 : i32, i32
  }
  func.func @transform_4(%arg0: i32) -> (i32, i32) {
    %c0_i32 = arith.constant 0 : i32
    %c0_i32_0 = arith.constant 0 : i32
    return %arg0, %c0_i32 : i32, i32
  }
}

</mosaic_0001>

<bundles_post_ra>
// kernel: tpu_custom_call.1
= control target key start
LH: loop header
LB: loop body
LE: loop exit
PB: predicated region body
PF: predicated region fallthrough
CT: control target
= control target key end

     0   :  { %s1017_s15 = smov 0   ;;  %s1387_s0 = inlined_call_operand.vmem [shape: f32[2,256,144], index: 0, kind: input, shape index: {}]   ;;  %s1388_s1 = inlined_call_operand.vmem [shape: f32[144,8], index: 1, kind: input, shape index: {}]   ;;  %s1389_s2 = inlined_call_operand.vmem [shape: f32[1,8], index: 2, kind: input, shape index: {}]   ;;  %s1390_s3 = inlined_call_operand.vmem [shape: f32[64,256], index: 3, kind: input, shape index: {}]   ;;  %s1391_s4 = inlined_call_operand.vmem [shape: f32[128,8], index: 4, kind: output, shape index: {}]  }
   0x1 LB: > { %s1023_s16 = sadd.s32 4294967295, %s989_s15   ;;  %p800_p0 = scmp.ge.s32.totalorder %s989_s15, 1  ;;  %s989_s15 = sphi %s1017_s15, %s14_s15  }
   0x2   : > { %p162_p1 = scmp.lt.s32.totalorder %s989_s15, 3 }
   0x4   : > { %p163_p2 = pnand %p800_p0, %p162_p1 }
   0x5   : > { %v263_v0 = vld [vmem:[%s1388_s1] sm:$0xff] (!%p163_p2)  ;;  %v264_v1 = vld [vmem:[%s1388_s1 + $0x8] sm:$0xff] (!%p163_p2)  ;;  %v265_v2 = vld [vmem:[%s1388_s1 + $0x10] sm:$0xff] (!%p163_p2)  ;;  %p188_p3 = scmp.lt.s32.totalorder (!%p163_p2), %s1023_s16, 1  ;;  %v991_v3 = vmov (!%p163_p2), 0.0|0.0   ;;  %vm288_vm0 = vcmask (!%p163_p2), 130048  }
   0x6   : > { %166 = sbr.rel (%p163_p2) target bundleno = 607 (0x25f), region = 36  ;;  %897 = vmatprep.subr.bf16.mxu0 (!%p163_p2), %v991_v3  ;;  %v898_v4 = vpack.c.bf16 (!%p163_p2), %v264_v1, %v263_v0  ;;  %v266_v5 = vld [vmem:[%s1388_s1 + $0x18] sm:$0xff] (!%p163_p2)  ;;  %956 = vmatprep.subr.bf16.mxu1 (!%p163_p2), %v991_v3  ;;  %v267_v7 = vld [vmem:[%s1388_s1 + $0x20] sm:$0xff] (!%p163_p2)  ;;  %v268_v8 = vld [vmem:[%s1388_s1 + $0x28] sm:$0xff] (!%p163_p2)  ;;  %s803_s20 = sshll.u32 (!%p163_p2), %s1023_s16, 3  ;;  %vm731_vm1 = vcmask (!%p163_p2), 64512  }
   0x7   : > { %v901_v6 = vpack.c.bf16 (!%p163_p2), %v266_v5, %v265_v2  ;;  %v904_v10 = vpack.c.bf16 (!%p163_p2), %v268_v8, %v267_v7  ;;  %v269_v11 = vld [vmem:[%s1388_s1 + $0x30] sm:$0xff] (!%p163_p2)  ;;  %v270_v12 = vld [vmem:[%s1388_s1 + $0x38] sm:$0xff] (!%p163_p2)  ;;  %v271_v14 = vld [vmem:[%s1388_s1 + $0x40] sm:$0xff] (!%p163_p2)  ;;  %p194_p4 = scmp.lt.s32.totalorder (!%p163_p2), %s803_s20, 15 }
   0x8   : > { %899 = vmatpush1.bf16.msra.mxu0 (!%p163_p2), %v898_v4  ;;  %965 = vmatpush1.bf16.msra.mxu1 (!%p163_p2), %v898_v4  ;;  %v907_v13 = vpack.c.bf16 (!%p163_p2), %v270_v12, %v269_v11  ;;  %v272_v15 = vld [vmem:[%s1388_s1 + $0x48] sm:$0xff] (!%p163_p2)  ;;  %v273_v18 = vld [vmem:[%s1388_s1 + $0x50] sm:$0xff] (!%p163_p2)  ;;  %v274_v19 = vld [vmem:[%s1388_s1 + $0x58] sm:$0xff] (!%p163_p2) }
   0x9   : > { %900 = vmatprep.subr.bf16.mxu0 (!%p163_p2), %v991_v3  ;;  %957 = vmatprep.subr.bf16.mxu1 (!%p163_p2), %v991_v3  ;;  %v910_v16 = vpack.c.bf16 (!%p163_p2), %v272_v15, %v271_v14  ;;  %v913_v20 = vpack.c.bf16 (!%p163_p2), %v274_v19, %v273_v18  ;;  %v275_v21 = vld [vmem:[%s1388_s1 + $0x60] sm:$0xff] (!%p163_p2)  ;;  %v276_v22 = vld [vmem:[%s1388_s1 + $0x68] sm:$0xff] (!%p163_p2)  ;;  %v277_v24 = vld [vmem:[%s1388_s1 + $0x70] sm:$0xff] (!%p163_p2) }
   0xa   : > { %v916_v23 = vpack.c.bf16 (!%p163_p2), %v276_v22, %v275_v21  ;;  %v278_v25 = vld [vmem:[%s1388_s1 + $0x78] sm:$0xff] (!%p163_p2)  ;;  %v279_v27 = vld [vmem:[%s1388_s1 + $0x80] sm:$0xff] (!%p163_p2)  ;;  %v280_v28 = vld [vmem:[%s1388_s1 + $0x88] sm:$0xff] (!%p163_p2) }
   0xb   : > { %v919_v26 = vpack.c.bf16 (!%p163_p2), %v278_v25, %v277_v24  ;;  %v922_v29 = vpack.c.bf16 (!%p163_p2), %v280_v28, %v279_v27  ;;  %v611_v28 = vld [vmem:[%s1390_s3 + $0x8] sm:$0xff] (!%p163_p2) }
   0xc   : > { %902 = vmatpush1.bf16.msra.mxu0 (!%p163_p2), %v901_v6  ;;  %966 = vmatpush1.bf16.msra.mxu1 (!%p163_p2), %v901_v6 }
   0xd   : > { %s189_s25 = scalar_select %p188_p3, %s1023_s16, 1  ;;  %903 = vmatprep.subr.bf16.mxu0 %v991_v3  ;;  %958 = vmatprep.subr.bf16.mxu1 %v991_v3 }
   0xe   : > { %s1393_s20 = smov (!%p194_p4, %s803_s20), 15 }
   0xf   : > { %s840_s30 = sshll.u32 %s189_s25, 9  ;;  %s804_s21 = sshll.u32 %s1393_s20, 3 }
  0x10   : > { %s1054_s7 = scalar_lea.vmem %s1387_s0, %s840_s30  ;;  %905 = vmatpush1.bf16.msra.mxu0 %v904_v10  ;;  %967 = vmatpush1.bf16.msra.mxu1 %v904_v10  ;;  %s1366_s24 = scalar_lea.vmem %s1391_s4, %s804_s21 }
  0x11   : > { %v200_v9 = vld [vmem:[%s1054_s7 + $0x8] sm:$0xff]  ;;  %906 = vmatprep.subr.bf16.mxu0 %v991_v3  ;;  %959 = vmatprep.subr.bf16.mxu1 %v991_v3  ;;  %v199_v30 = vld [vmem:[%s1054_s7] sm:$0xff]  ;;  %v202_v31 = vld [vmem:[%s1054_s7 + $0x18] sm:$0xff] }
  0x12   : > { %806 = vmatprep.mubr.msk.f32.mxu0 %vm288_vm0, %v200_v9  ;;  %v240_v17 = vld [vmem:[%s1054_s7 + $0x148] sm:$0xff]  ;;  %v239_v32 = vld [vmem:[%s1054_s7 + $0x140] sm:$0xff]  ;;  %v242_v33 = vld [vmem:[%s1054_s7 + $0x158] sm:$0xff] }
  0x13   : > { %826 = vmatprep.mubr.msk.f32.mxu1 %vm288_vm0, %v240_v17  ;;  %v201_v34 = vld [vmem:[%s1054_s7 + $0x10] sm:$0xff]  ;;  %v204_v35 = vld [vmem:[%s1054_s7 + $0x28] sm:$0xff]  ;;  %v203_v38 = vld [vmem:[%s1054_s7 + $0x20] sm:$0xff] }
  0x14   : > { %908 = vmatpush1.bf16.msra.mxu0 %v907_v13  ;;  %968 = vmatpush1.bf16.msra.mxu1 %v907_v13  ;;  %v241_v36 = vld [vmem:[%s1054_s7 + $0x150] sm:$0xff]  ;;  %v244_v37 = vld [vmem:[%s1054_s7 + $0x168] sm:$0xff]  ;;  %v206_v39 = vld [vmem:[%s1054_s7 + $0x38] sm:$0xff] }
  0x15   : > { %909 = vmatprep.subr.bf16.mxu0 %v991_v3  ;;  %960 = vmatprep.subr.bf16.mxu1 %v991_v3  ;;  %v243_v40 = vld [vmem:[%s1054_s7 + $0x160] sm:$0xff]  ;;  %v246_v41 = vld [vmem:[%s1054_s7 + $0x178] sm:$0xff]  ;;  %v205_v42 = vld [vmem:[%s1054_s7 + $0x30] sm:$0xff] }
  0x16   : > { %v208_v43 = vld [vmem:[%s1054_s7 + $0x48] sm:$0xff]  ;;  %v245_v44 = vld [vmem:[%s1054_s7 + $0x170] sm:$0xff]  ;;  %v207_v46 = vld [vmem:[%s1054_s7 + $0x40] sm:$0xff] }
  0x17   : > { %v248_v45 = vld [vmem:[%s1054_s7 + $0x188] sm:$0xff]  ;;  %v210_v47 = vld [vmem:[%s1054_s7 + $0x58] sm:$0xff]  ;;  %v247_v48 = vld [vmem:[%s1054_s7 + $0x180] sm:$0xff] }
  0x18   : > { %911 = vmatpush1.bf16.msra.mxu0 %v910_v16  ;;  %969 = vmatpush1.bf16.msra.mxu1 %v910_v16  ;;  %v250_v49 = vld [vmem:[%s1054_s7 + $0x198] sm:$0xff]  ;;  %v209_v50 = vld [vmem:[%s1054_s7 + $0x50] sm:$0xff]  ;;  %v212_v51 = vld [vmem:[%s1054_s7 + $0x68] sm:$0xff] }
  0x19   : > { %912 = vmatprep.subr.bf16.mxu0 %v991_v3  ;;  %961 = vmatprep.subr.bf16.mxu1 %v991_v3  ;;  %v249_v52 = vld [vmem:[%s1054_s7 + $0x190] sm:$0xff]  ;;  %v252_v53 = vld [vmem:[%s1054_s7 + $0x1a8] sm:$0xff]  ;;  %v211_v54 = vld [vmem:[%s1054_s7 + $0x60] sm:$0xff] }
  0x1a   : > { %v214_v55 = vld [vmem:[%s1054_s7 + $0x78] sm:$0xff]  ;;  %v251_v56 = vld [vmem:[%s1054_s7 + $0x1a0] sm:$0xff]  ;;  %v213_v58 = vld [vmem:[%s1054_s7 + $0x70] sm:$0xff] }
  0x1b   : > { %v254_v57 = vld [vmem:[%s1054_s7 + $0x1b8] sm:$0xff]  ;;  %v216_v59 = vld [vmem:[%s1054_s7 + $0x88] sm:$0xff]  ;;  %v253_v60 = vld [vmem:[%s1054_s7 + $0x1b0] sm:$0xff] }
  0x1c   : > { %914 = vmatpush1.bf16.msra.mxu0 %v913_v20  ;;  %970 = vmatpush1.bf16.msra.mxu1 %v913_v20  ;;  %v256_v61 = vld [vmem:[%s1054_s7 + $0x1c8] sm:$0xff]  ;;  %v215_v62 = vld [vmem:[%s1054_s7 + $0x80] sm:$0xff]  ;;  %v218_v63 = vld [vmem:[%s1054_s7 + $0x98] sm:$0xff] }
  0x1d   : > { %915 = vmatprep.subr.bf16.mxu0 %v991_v3  ;;  %962 = vmatprep.subr.bf16.mxu1 %v991_v3  ;;  %v255_v0 = vld [vmem:[%s1054_s7 + $0x1c0] sm:$0xff]  ;;  %v258_v1 = vld [vmem:[%s1054_s7 + $0x1d8] sm:$0xff]  ;;  %v217_v2 = vld [vmem:[%s1054_s7 + $0x90] sm:$0xff] }
  0x1e   : > { %v257_v4 = vld [vmem:[%s1054_s7 + $0x1d0] sm:$0xff]  ;;  %v260_v5 = vld [vmem:[%s1054_s7 + $0x1e8] sm:$0xff]  ;;  %v219_v6 = vld [vmem:[%s1054_s7 + $0xa0] sm:$0xff] }
  0x1f   : > { %v222_v7 = vld [vmem:[%s1054_s7 + $0xb8] sm:$0xff]  ;;  %v259_v8 = vld [vmem:[%s1054_s7 + $0x1e0] sm:$0xff]  ;;  %v221_v10 = vld [vmem:[%s1054_s7 + $0xb0] sm:$0xff] }
  0x20   : > { %917 = vmatpush1.bf16.msra.mxu0 %v916_v23  ;;  %971 = vmatpush1.bf16.msra.mxu1 %v916_v23  ;;  %v262_v9 = vld [vmem:[%s1054_s7 + $0x1f8] sm:$0xff]  ;;  %v224_v11 = vld [vmem:[%s1054_s7 + $0xc8] sm:$0xff]  ;;  %v261_v12 = vld [vmem:[%s1054_s7 + $0x1f0] sm:$0xff] }
  0x21   : > { %918 = vmatprep.subr.bf16.mxu0 %v991_v3  ;;  %963 = vmatprep.subr.bf16.mxu1 %v991_v3  ;;  %v223_v13 = vld [vmem:[%s1054_s7 + $0xc0] sm:$0xff]  ;;  %v226_v14 = vld [vmem:[%s1054_s7 + $0xd8] sm:$0xff]  ;;  %v225_v15 = vld [vmem:[%s1054_s7 + $0xd0] sm:$0xff] }
  0x22   : > { %v228_v16 = vld [vmem:[%s1054_s7 + $0xe8] sm:$0xff]  ;;  %v227_v17 = vld [vmem:[%s1054_s7 + $0xe0] sm:$0xff]  ;;  %v230_v18 = vld [vmem:[%s1054_s7 + $0xf8] sm:$0xff] }
  0x23   : > { %v229_v19 = vld [vmem:[%s1054_s7 + $0xf0] sm:$0xff]  ;;  %v232_v20 = vld [vmem:[%s1054_s7 + $0x108] sm:$0xff]  ;;  %v231_v21 = vld [vmem:[%s1054_s7 + $0x100] sm:$0xff] }
  0x24   : > { %920 = vmatpush1.bf16.msra.mxu0 %v919_v26  ;;  %972 = vmatpush1.bf16.msra.mxu1 %v919_v26  ;;  %v234_v22 = vld [vmem:[%s1054_s7 + $0x118] sm:$0xff]  ;;  %v233_v23 = vld [vmem:[%s1054_s7 + $0x110] sm:$0xff]  ;;  %v236_v24 = vld [vmem:[%s1054_s7 + $0x128] sm:$0xff] }
  0x25   : > { %921 = vmatprep.subr.bf16.mxu0 %v991_v3  ;;  %964 = vmatprep.subr.bf16.mxu1 %v991_v3  ;;  %v220_v3 = vld [vmem:[%s1054_s7 + $0xa8] sm:$0xff]  ;;  %v235_v25 = vld [vmem:[%s1054_s7 + $0x120] sm:$0xff]  ;;  %v238_v26 = vld [vmem:[%s1054_s7 + $0x138] sm:$0xff] }
  0x26   : > { %v237_v27 = vld [vmem:[%s1054_s7 + $0x130] sm:$0xff] }
  0x28   : > { %923 = vmatpush1.bf16.msra.mxu0 %v922_v29  ;;  %973 = vmatpush1.bf16.msra.mxu1 %v922_v29 }
  0x2b   : > { %450 = vmatmul.mubr.f32.vlgmr.msra.gmra.mrb[0].mxu0 %v199_v30  ;;  %550 = vmatmul.mubr.f32.vlgmr.msra.gmra.mrb[0].mxu1 %v239_v32  ;;  %v1208_v32 = vld [vmem:[%s1389_s2] ss:$0 sm:$0xff] }
  0x2c   : > { %807 = vmatprep.mubr.msk.f32.mxu0 %vm288_vm0, %v202_v31  ;;  %827 = vmatprep.mubr.msk.f32.mxu1 %vm288_vm0, %v242_v33 }
  0x2f   : > { %455 = vmatmul.mubr.f32.gmra.mrb[2].mxu0 %v201_v34  ;;  %555 = vmatmul.mubr.f32.gmra.mrb[2].mxu1 %v241_v36 }
  0x30   : > { %808 = vmatprep.mubr.msk.f32.mxu0 %vm288_vm0, %v204_v35  ;;  %828 = vmatprep.mubr.msk.f32.mxu1 %vm288_vm0, %v244_v37 }
  0x33   : > { %460 = vmatmul.mubr.f32.gmra.mrb[4].mxu0 %v203_v38  ;;  %560 = vmatmul.mubr.f32.gmra.mrb[4].mxu1 %v243_v40 }
  0x34   : > { %809 = vmatprep.mubr.msk.f32.mxu0 %vm288_vm0, %v206_v39  ;;  %829 = vmatprep.mubr.msk.f32.mxu1 %vm288_vm0, %v246_v41 }
  0x37   : > { %465 = vmatmul.mubr.f32.gmra.mrb[6].mxu0 %v205_v42  ;;  %565 = vmatmul.mubr.f32.gmra.mrb[6].mxu1 %v245_v44 }
  0x38   : > { %810 = vmatprep.mubr.msk.f32.mxu0 %vm288_vm0, %v208_v43  ;;  %830 = vmatprep.mubr.msk.f32.mxu1 %vm288_vm0, %v248_v45 }
  0x3b   : > { %470 = vmatmul.mubr.f32.gmra.mrb[8].mxu0 %v207_v46  ;;  %570 = vmatmul.mubr.f32.gmra.mrb[8].mxu1 %v247_v48 }
  0x3c   : > { %811 = vmatprep.mubr.msk.f32.mxu0 %vm288_vm0, %v210_v47  ;;  %831 = vmatprep.mubr.msk.f32.mxu1 %vm288_vm0, %v250_v49 }
  0x3f   : > { %475 = vmatmul.mubr.f32.gmra.mrb[10].mxu0 %v209_v50  ;;  %575 = vmatmul.mubr.f32.gmra.mrb[10].mxu1 %v249_v52 }
  0x40   : > { %812 = vmatprep.mubr.msk.f32.mxu0 %vm288_vm0, %v212_v51  ;;  %832 = vmatprep.mubr.msk.f32.mxu1 %vm288_vm0, %v252_v53 }
  0x43   : > { %480 = vmatmul.mubr.f32.gmra.mrb[12].mxu0 %v211_v54  ;;  %580 = vmatmul.mubr.f32.gmra.mrb[12].mxu1 %v251_v56 }
  0x44   : > { %813 = vmatprep.mubr.msk.f32.mxu0 %vm288_vm0, %v214_v55  ;;  %833 = vmatprep.mubr.msk.f32.mxu1 %vm288_vm0, %v254_v57 }
  0x47   : > { %485 = vmatmul.mubr.f32.gmra.mrb[14].mxu0 %v213_v58  ;;  %585 = vmatmul.mubr.f32.gmra.mrb[14].mxu1 %v253_v60 }
  0x48   : > { %814 = vmatprep.mubr.msk.f32.mxu0 %vm288_vm0, %v216_v59  ;;  %834 = vmatprep.mubr.msk.f32.mxu1 %vm288_vm0, %v256_v61 }
  0x4b   : > { %490 = vmatmul.mubr.f32.gmra.mrb[16].mxu0 %v215_v62  ;;  %590 = vmatmul.mubr.f32.gmra.mrb[16].mxu1 %v255_v0 }
  0x4c   : > { %815 = vmatprep.mubr.msk.f32.mxu0 %vm288_vm0, %v218_v63  ;;  %835 = vmatprep.mubr.msk.f32.mxu1 %vm288_vm0, %v258_v1 }
  0x4f   : > { %495 = vmatmul.mubr.f32.gmra.mrb[18].mxu0 %v217_v2  ;;  %595 = vmatmul.mubr.f32.gmra.mrb[18].mxu1 %v257_v4 }
  0x50   : > { %816 = vmatprep.mubr.msk.f32.mxu0 %vm288_vm0, %v220_v3  ;;  %836 = vmatprep.mubr.msk.f32.mxu1 %vm288_vm0, %v260_v5 }
  0x53   : > { %500 = vmatmul.mubr.f32.gmra.mrb[20].mxu0 %v219_v6  ;;  %600 = vmatmul.mubr.f32.gmra.mrb[20].mxu1 %v259_v8 }
  0x54   : > { %817 = vmatprep.mubr.msk.f32.mxu0 %vm288_vm0, %v222_v7  ;;  %837 = vmatprep.mubr.msk.f32.mxu1 %vm288_vm0, %v262_v9 }
  0x57   : > { %505 = vmatmul.mubr.f32.gmra.mrb[22].mxu0 %v221_v10  ;;  %605 = vmatmul.mubr.f32.gmra.mrb[22].mxu1 %v261_v12 }
  0x58   : > { %818 = vmatprep.mubr.msk.f32.mxu0 %vm288_vm0, %v224_v11  ;;  %690 = vmatprep.mubr.f32.mxu1 %v611_v28 }
  0x5b   : > { %510 = vmatmul.mubr.f32.gmra.mrb[24].mxu0 %v223_v13 }
  0x5c   : > { %819 = vmatprep.mubr.msk.f32.mxu0 %vm288_vm0, %v226_v14 }
  0x5f   : > { %515 = vmatmul.mubr.f32.gmra.mrb[26].mxu0 %v225_v15 }
  0x60   : > { %820 = vmatprep.mubr.msk.f32.mxu0 %vm288_vm0, %v228_v16 }
  0x63   : > { %520 = vmatmul.mubr.f32.gmra.mrb[28].mxu0 %v227_v17 }
  0x64   : > { %821 = vmatprep.mubr.msk.f32.mxu0 %vm288_vm0, %v230_v18 }
  0x67   : > { %525 = vmatmul.mubr.f32.gmra.mrb[30].mxu0 %v229_v19 }
  0x68   : > { %822 = vmatprep.mubr.msk.f32.mxu0 %vm288_vm0, %v232_v20 }
  0x6b   : > { %530 = vmatmul.mubr.f32.gmra.mrb[32].mxu0 %v231_v21 }
  0x6c   : > { %823 = vmatprep.mubr.msk.f32.mxu0 %vm288_vm0, %v234_v22 }
  0x6f   : > { %535 = vmatmul.mubr.f32.gmra.mrb[34].mxu0 %v233_v23 }
  0x70   : > { %824 = vmatprep.mubr.msk.f32.mxu0 %vm288_vm0, %v236_v24 }
  0x73   : > { %540 = vmatmul.mubr.f32.gmra.mrb[36].mxu0 %v235_v25 }
  0x74   : > { %825 = vmatprep.mubr.msk.f32.mxu0 %vm288_vm0, %v238_v26 }
  0x77   : > { %545 = vmatmul.mubr.f32.gmra.mrb[38].mxu0 %v237_v27 }
  0xfe   : > { %v451_v29 = vpop.f32.mrb[0].mxu0  ;;  %v551_v31 = vpop.f32.mrb[0].mxu1 }
  0xff   : > { %v453_v30 = vpop.f32.mrb[1].mxu0  ;;  %v553_v33 = vpop.f32.mrb[1].mxu1  ;;  %v1211_v35 = vadd.f32 %v1208_v32, %v551_v31  ;;  %v1214_v36 = vadd.f32 %v1208_v32, %v451_v29 }
 0x102   : > { %v456_v34 = vpop.f32.mrb[2].mxu0  ;;  %v556_v39 = vpop.f32.mrb[2].mxu1 }
 0x103   : > { %v1217_v37 = vadd.f32 %v1208_v32, %v456_v34  ;;  %v458_v38 = vpop.f32.mrb[3].mxu0  ;;  %v1220_v40 = vadd.f32 %v1208_v32, %v556_v39  ;;  %v558_v41 = vpop.f32.mrb[3].mxu1 }
 0x105   : > { %v926_v42 = vpack.c.bf16 %v1217_v37, %v1214_v36  ;;  %v932_v44 = vpack.c.bf16 %v1220_v40, %v1211_v35  ;;  %v613_v35 = vld [vmem:[%s1390_s3 + $0x18] sm:$0xff]  ;;  %v612_v36 = vld [vmem:[%s1390_s3 + $0x10] sm:$0xff]  ;;  %v615_v37 = vld [vmem:[%s1390_s3 + $0x28] sm:$0xff] }
 0x106   : > { %v461_v43 = vpop.f32.mrb[4].mxu0  ;;  %v561_v46 = vpop.f32.mrb[4].mxu1  ;;  %v614_v40 = vld [vmem:[%s1390_s3 + $0x20] sm:$0xff] }
 0x107   : > { %v463_v45 = vpop.f32.mrb[5].mxu0  ;;  %v563_v47 = vpop.f32.mrb[5].mxu1  ;;  %v1227_v49 = vadd.f32 %v1208_v32, %v561_v46  ;;  %v1230_v50 = vadd.f32 %v1208_v32, %v461_v43 }
 0x10a   : > { %v466_v48 = vpop.f32.mrb[6].mxu0  ;;  %v566_v53 = vpop.f32.mrb[6].mxu1 }
 0x10b   : > { %v1233_v51 = vadd.f32 %v1208_v32, %v466_v48  ;;  %v468_v52 = vpop.f32.mrb[7].mxu0  ;;  %v1236_v54 = vadd.f32 %v1208_v32, %v566_v53  ;;  %v568_v55 = vpop.f32.mrb[7].mxu1 }
 0x10d   : > { %v930_v56 = vpack.c.bf16 %v1233_v51, %v1230_v50  ;;  %v936_v58 = vpack.c.bf16 %v1236_v54, %v1227_v49  ;;  %v619_v49 = vld [vmem:[%s1390_s3 + $0x48] sm:$0xff]  ;;  %v618_v50 = vld [vmem:[%s1390_s3 + $0x40] sm:$0xff]  ;;  %v621_v51 = vld [vmem:[%s1390_s3 + $0x58] sm:$0xff] }
 0x10e   : > { %v471_v57 = vpop.f32.mrb[8].mxu0  ;;  %v571_v60 = vpop.f32.mrb[8].mxu1  ;;  %v620_v54 = vld [vmem:[%s1390_s3 + $0x50] sm:$0xff] }
 0x10f   : > { %v473_v59 = vpop.f32.mrb[9].mxu0  ;;  %v573_v61 = vpop.f32.mrb[9].mxu1  ;;  %v1243_v63 = vadd.f32 %v1208_v32, %v571_v60  ;;  %v1246_v0 = vadd.f32 %v1208_v32, %v471_v57 }
 0x112   : > { %v476_v62 = vpop.f32.mrb[10].mxu0  ;;  %v576_v3 = vpop.f32.mrb[10].mxu1 }
 0x113   : > { %v1249_v1 = vadd.f32 %v1208_v32, %v476_v62  ;;  %v478_v2 = vpop.f32.mrb[11].mxu0  ;;  %v1252_v4 = vadd.f32 %v1208_v32, %v576_v3  ;;  %v578_v5 = vpop.f32.mrb[11].mxu1 }
 0x115   : > { %v934_v6 = vpack.c.bf16 %v1249_v1, %v1246_v0  ;;  %v940_v8 = vpack.c.bf16 %v1252_v4, %v1243_v63  ;;  %v625_v63 = vld [vmem:[%s1390_s3 + $0x78] sm:$0xff]  ;;  %v624_v0 = vld [vmem:[%s1390_s3 + $0x70] sm:$0xff] }
 0x116   : > { %v481_v7 = vpop.f32.mrb[12].mxu0  ;;  %v581_v10 = vpop.f32.mrb[12].mxu1 }
 0x117   : > { %v483_v9 = vpop.f32.mrb[13].mxu0  ;;  %v583_v11 = vpop.f32.mrb[13].mxu1  ;;  %v1259_v13 = vadd.f32 %v1208_v32, %v581_v10  ;;  %v1262_v14 = vadd.f32 %v1208_v32, %v481_v7 }
 0x11a   : > { %v486_v12 = vpop.f32.mrb[14].mxu0  ;;  %v586_v17 = vpop.f32.mrb[14].mxu1 }
 0x11b   : > { %v1265_v15 = vadd.f32 %v1208_v32, %v486_v12  ;;  %v488_v16 = vpop.f32.mrb[15].mxu0  ;;  %v1268_v18 = vadd.f32 %v1208_v32, %v586_v17  ;;  %v588_v19 = vpop.f32.mrb[15].mxu1 }
 0x11d   : > { %v938_v20 = vpack.c.bf16 %v1265_v15, %v1262_v14  ;;  %v944_v22 = vpack.c.bf16 %v1268_v18, %v1259_v13 }
 0x11e   : > { %v491_v21 = vpop.f32.mrb[16].mxu0  ;;  %v591_v24 = vpop.f32.mrb[16].mxu1 }
 0x11f   : > { %v493_v23 = vpop.f32.mrb[17].mxu0  ;;  %v593_v25 = vpop.f32.mrb[17].mxu1  ;;  %v1275_v27 = vadd.f32 %v1208_v32, %v591_v24  ;;  %v492_v28 = vadd.f32 %v1208_v32, %v491_v21 }
 0x122   : > { %v496_v26 = vpop.f32.mrb[18].mxu0  ;;  %v596_v31 = vpop.f32.mrb[18].mxu1 }
 0x123   : > { %v497_v29 = vadd.f32 %v1208_v32, %v496_v26  ;;  %v498_v30 = vpop.f32.mrb[19].mxu0  ;;  %v597_v33 = vadd.f32 %v1208_v32, %v596_v31  ;;  %v598_v34 = vpop.f32.mrb[19].mxu1 }
 0x125   : > { %v942_v38 = vpack.c.bf16 %v497_v29, %v492_v28  ;;  %v948_v41 = vpack.c.bf16 %v597_v33, %v1275_v27 }
 0x126   : > { %v501_v39 = vpop.f32.mrb[20].mxu0  ;;  %v601_v45 = vpop.f32.mrb[20].mxu1 }
 0x127   : > { %v503_v43 = vpop.f32.mrb[21].mxu0  ;;  %v603_v46 = vpop.f32.mrb[21].mxu1  ;;  %v602_v48 = vadd.f32 %v1208_v32, %v601_v45  ;;  %v502_v52 = vadd.f32 %v1208_v32, %v501_v39 }
 0x12a   : > { %v506_v47 = vpop.f32.mrb[22].mxu0  ;;  %v606_v57 = vpop.f32.mrb[22].mxu1 }
 0x12b   : > { %v507_v53 = vadd.f32 %v1208_v32, %v506_v47  ;;  %v508_v55 = vpop.f32.mrb[23].mxu0  ;;  %v607_v59 = vadd.f32 %v1208_v32, %v606_v57  ;;  %v608_v60 = vpop.f32.mrb[23].mxu1 }
 0x12d   : > { %v946_v61 = vpack.c.bf16 %v507_v53, %v502_v52  ;;  %v952_v2 = vpack.c.bf16 %v607_v59, %v602_v48 }
 0x12e   : > { %v511_v62 = vpop.f32.mrb[24].mxu0 }
 0x12f   : > { %v513_v3 = vpop.f32.mrb[25].mxu0  ;;  %v512_v7 = vadd.f32 %v1208_v32, %v511_v62 }
 0x132   : > { %v516_v5 = vpop.f32.mrb[26].mxu0 }
 0x133   : > { %v517_v9 = vadd.f32 %v1208_v32, %v516_v5  ;;  %v518_v10 = vpop.f32.mrb[27].mxu0 }
 0x135   : > { %v950_v11 = vpack.c.bf16 %v517_v9, %v512_v7 }
 0x136   : > { %v521_v12 = vpop.f32.mrb[28].mxu0 }
 0x137   : > { %v523_v16 = vpop.f32.mrb[29].mxu0  ;;  %v522_v19 = vadd.f32 %v1208_v32, %v521_v12 }
 0x13a   : > { %v526_v17 = vpop.f32.mrb[30].mxu0 }
 0x13b   : > { %v527_v21 = vadd.f32 %v1208_v32, %v526_v17  ;;  %v528_v23 = vpop.f32.mrb[31].mxu0 }
 0x13d   : > { %v954_v24 = vpack.c.bf16 %v527_v21, %v522_v19 }
 0x13e   : > { %v531_v25 = vpop.f32.mrb[32].mxu0 }
 0x13f   : > { %v533_v26 = vpop.f32.mrb[33].mxu0  ;;  %v532_v28 = vadd.f32 %v1208_v32, %v531_v25 }
 0x142   : > { %v536_v27 = vpop.f32.mrb[34].mxu0 }
 0x143   : > { %v537_v29 = vadd.f32 %v1208_v32, %v536_v27  ;;  %v538_v30 = vpop.f32.mrb[35].mxu0 }
 0x145   : > { %v924_v31 = vpack.c.bf16 %v537_v29, %v532_v28 }
 0x146   : > { %v541_v33 = vpop.f32.mrb[36].mxu0 }
 0x147   : > { %v543_v34 = vpop.f32.mrb[37].mxu0  ;;  %925 = vmatprep.subr.bf16.mxu1 %v924_v31  ;;  %v542_v43 = vadd.f32 %v1208_v32, %v541_v33 }
 0x148   : > { %927 = vmatpush3.bf16.msra.mxu1 %v926_v42  ;;  %v617_v42 = vld [vmem:[%s1390_s3 + $0x38] sm:$0xff] }
 0x14a   : > { %v546_v39 = vpop.f32.mrb[38].mxu0 }
 0x14b   : > { %v547_v45 = vadd.f32 %v1208_v32, %v546_v39  ;;  %v548_v46 = vpop.f32.mrb[39].mxu0  ;;  %v610_v32 = vld [vmem:[%s1390_s3] sm:$0xff] }
 0x14d   : > { %v928_v47 = vpack.c.bf16 %v547_v45, %v542_v43 }
 0x14f   : > { %929 = vmatprep.subr.bf16.mxu1 %v928_v47 }
 0x150   : > { %931 = vmatpush3.bf16.msra.mxu1 %v930_v56  ;;  %v623_v56 = vld [vmem:[%s1390_s3 + $0x68] sm:$0xff] }
 0x151   : > { %933 = vmatprep.subr.bf16.mxu1 %v932_v44  ;;  %v616_v44 = vld [vmem:[%s1390_s3 + $0x30] sm:$0xff] }
 0x154   : > { %935 = vmatpush3.bf16.msra.mxu1 %v934_v6 }
 0x155   : > { %937 = vmatprep.subr.bf16.mxu1 %v936_v58  ;;  %v622_v58 = vld [vmem:[%s1390_s3 + $0x60] sm:$0xff] }
 0x158   : > { %939 = vmatpush3.bf16.msra.mxu1 %v938_v20 }
 0x159   : > { %941 = vmatprep.subr.bf16.mxu1 %v940_v8 }
 0x15c   : > { %943 = vmatpush3.bf16.msra.mxu1 %v942_v38 }
 0x15d   : > { %945 = vmatprep.subr.bf16.mxu1 %v944_v22 }
 0x160   : > { %947 = vmatpush3.bf16.msra.mxu1 %v946_v61 }
 0x161   : > { %949 = vmatprep.subr.bf16.mxu1 %v948_v41 }
 0x164   : > { %951 = vmatpush3.bf16.msra.mxu1 %v950_v11 }
 0x165   : > { %953 = vmatprep.subr.bf16.mxu1 %v952_v2 }
 0x168   : > { %955 = vmatpush3.bf16.msra.mxu1 %v954_v24 }
 0x16b   : > { %691 = vmatmul.mubr.f32.vlgmr.msra.gmra.mrb[24].mxu1 %v610_v32 }
 0x16c   : > { %695 = vmatprep.mubr.f32.mxu1 %v613_v35 }
 0x16f   : > { %696 = vmatmul.mubr.f32.gmra.mrb[26].mxu1 %v612_v36 }
 0x170   : > { %700 = vmatprep.mubr.f32.mxu1 %v615_v37 }
 0x173   : > { %701 = vmatmul.mubr.f32.gmra.mrb[28].mxu1 %v614_v40 }
 0x174   : > { %705 = vmatprep.mubr.f32.mxu1 %v617_v42 }
 0x177   : > { %706 = vmatmul.mubr.f32.gmra.mrb[30].mxu1 %v616_v44 }
 0x178   : > { %710 = vmatprep.mubr.f32.mxu1 %v619_v49 }
 0x17b   : > { %711 = vmatmul.mubr.f32.gmra.mrb[32].mxu1 %v618_v50 }
 0x17c   : > { %715 = vmatprep.mubr.f32.mxu1 %v621_v51 }
 0x17f   : > { %716 = vmatmul.mubr.f32.gmra.mrb[34].mxu1 %v620_v54 }
 0x180   : > { %720 = vmatprep.mubr.f32.mxu1 %v623_v56 }
 0x183   : > { %721 = vmatmul.mubr.f32.gmra.mrb[36].mxu1 %v622_v58 }
 0x184   : > { %725 = vmatprep.mubr.f32.mxu1 %v625_v63 }
 0x187   : > { %726 = vmatmul.mubr.f32.gmra.mrb[38].mxu1 %v624_v0 }
 0x23e   : > { %v873_v1 = vpop.f32.mrb[24].mxu1 }
 0x23f   : > { %v874_v4 = vpop.f32.mrb[25].mxu1 }
 0x240   : > { %v875_v6 = vadd.f32 %v874_v4, %v873_v1 }
 0x242   : > { %732 = vst.msk [vmem:[%s1366_s24] sm:$0xff] %vm731_vm1, %v875_v6  ;;  %v876_v8 = vpop.f32.mrb[26].mxu1 }
 0x243   : > { %v877_v13 = vpop.f32.mrb[27].mxu1 }
 0x244   : > { %v878_v14 = vadd.f32 %v877_v13, %v876_v8 }
 0x246   : > { %733 = vst.msk [vmem:[%s1366_s24 + $0x8] sm:$0xff] %vm731_vm1, %v878_v14  ;;  %v879_v15 = vpop.f32.mrb[28].mxu1 }
 0x247   : > { %v880_v18 = vpop.f32.mrb[29].mxu1 }
 0x248   : > { %v881_v20 = vadd.f32 %v880_v18, %v879_v15 }
 0x24a   : > { %734 = vst.msk [vmem:[%s1366_s24 + $0x10] sm:$0xff] %vm731_vm1, %v881_v20  ;;  %v882_v22 = vpop.f32.mrb[30].mxu1 }
 0x24b   : > { %v883_v38 = vpop.f32.mrb[31].mxu1 }
 0x24c   : > { %v884_v41 = vadd.f32 %v883_v38, %v882_v22 }
 0x24e   : > { %735 = vst.msk [vmem:[%s1366_s24 + $0x18] sm:$0xff] %vm731_vm1, %v884_v41  ;;  %v885_v48 = vpop.f32.mrb[32].mxu1 }
 0x24f   : > { %v886_v52 = vpop.f32.mrb[33].mxu1 }
 0x250   : > { %v887_v53 = vadd.f32 %v886_v52, %v885_v48 }
 0x252   : > { %736 = vst.msk [vmem:[%s1366_s24 + $0x20] sm:$0xff] %vm731_vm1, %v887_v53  ;;  %v888_v55 = vpop.f32.mrb[34].mxu1 }
 0x253   : > { %v889_v57 = vpop.f32.mrb[35].mxu1 }
 0x254   : > { %v890_v59 = vadd.f32 %v889_v57, %v888_v55 }
 0x256   : > { %737 = vst.msk [vmem:[%s1366_s24 + $0x28] sm:$0xff] %vm731_vm1, %v890_v59  ;;  %v891_v60 = vpop.f32.mrb[36].mxu1 }
 0x257   : > { %v892_v61 = vpop.f32.mrb[37].mxu1 }
 0x258   : > { %v893_v62 = vadd.f32 %v892_v61, %v891_v60 }
 0x25a   : > { %738 = vst.msk [vmem:[%s1366_s24 + $0x30] sm:$0xff] %vm731_vm1, %v893_v62  ;;  %v894_v2 = vpop.f32.mrb[38].mxu1 }
 0x25b   : > { %v895_v3 = vpop.f32.mrb[39].mxu1 }
 0x25c   : > { %v896_v5 = vadd.f32 %v895_v3, %v894_v2 }
 0x25e   : > { %739 = vst.msk [vmem:[%s1366_s24 + $0x38] sm:$0xff] %vm731_vm1, %v896_v5 }
 0x25f PF: > { %s14_s15 = sadd.s32 1, %s989_s15  }
 0x260   : > { %p11_p5 = scmp.ge.s32.totalorder %s14_s15, 4  }
 0x262   :  { %13 = sbr.rel (!%p11_p5) target bundleno = 1 (0x1), region = 66 }

</bundles_post_ra>
